<compile_context>
chip_gen: v7x
topology: tpu7x:2x2x1
jax: 0.10.0
libtpu: 0.0.40
codegen_flags: <defaults>
</compile_context>

<pallas_src>
import jax
import jax.numpy as jnp
from jax.experimental import pallas as pl
from jax.experimental.pallas import tpu as pltpu


def _cdiv(a, b):
    return -(-a // b)


def _round_up(a, m):
    return _cdiv(a, m) * m


def _mlp_softmax_kernel(xt_ref, w1t_ref, b1t_ref, w2t_ref, b2t_ref, ot_ref):
    # Layer 1: h^T = relu(w1^T @ x^T + b1)   -> (20, TB), batch on lanes.
    h = jnp.dot(w1t_ref[...], xt_ref[...], preferred_element_type=jnp.float32)
    h = jnp.maximum(h + b1t_ref[...], 0.0)          # (20,1) broadcast over lanes

    # Layer 2: logits^T = w2^T @ h^T + b2    -> (5, TB)
    logits = jnp.dot(w2t_ref[...], h, preferred_element_type=jnp.float32)
    logits = logits + b2t_ref[...]                  # (5,1) broadcast over lanes

    # Softmax over the 5-class (sublane) axis; exact divide so columns sum to 1.
    m = jnp.max(logits, axis=0, keepdims=True)
    e = jnp.exp(logits - m)
    denom = jnp.sum(e, axis=0, keepdims=True)
    ot_ref[...] = (e / denom).astype(ot_ref.dtype)


def red_neuronal_ligera(x, w1, b1, w2, b2, *, tb=8192):
    """x: [B, 10] f32; w1: [10, 20]; b1: [20]; w2: [20, 5]; b2: [5] -> [B, 5]."""
    B, F_in = x.shape
    F_hid = w1.shape[1]
    F_out = w2.shape[1]

    # Transposed ("batch-on-lanes") operands. Tiny: stay VMEM-resident.
    w1t = w1.T                      # (20, 10)
    w2t = w2.T                      # (5, 20)
    b1t = b1.reshape(F_hid, 1)      # (20, 1)
    b2t = b2.reshape(F_out, 1)      # (5, 1)

    # Batch (lane) tiling: tile must be a multiple of 128 lanes.
    b128 = _round_up(B, 128)
    tb_cap = max(128, (tb // 128) * 128)
    n_tiles = _cdiv(b128, tb_cap)
    if b128 >= 256:
        # Ensure >=2 grid steps so v7x's two TensorCores both get work.
        n_tiles = max(n_tiles, 2)
    tb_eff = max(128, _round_up(_cdiv(b128, n_tiles), 128))
    b_padded = n_tiles * tb_eff

    # One-time pad + transpose in the wrapper (single fused copy). Padded
    # columns produce softmax(b2) in the kernel and are sliced off below.
    x_t = jnp.pad(x, ((0, b_padded - B), (0, 0))).T   # (10, b_padded)

    grid = (b_padded // tb_eff,)

    out_t = pl.pallas_call(
        _mlp_softmax_kernel,
        out_shape=jax.ShapeDtypeStruct((F_out, b_padded), jnp.float32),
        grid=grid,
        in_specs=[
            # x^T: tiled over the lane (batch) axis -> auto double-buffered DMA.
            pl.BlockSpec((F_in, tb_eff), lambda i: (0, i)),
            # Weights / biases: constant index maps -> DMA'd once, resident.
            pl.BlockSpec(w1t.shape, lambda i: (0, 0)),
            pl.BlockSpec(b1t.shape, lambda i: (0, 0)),
            pl.BlockSpec(w2t.shape, lambda i: (0, 0)),
            pl.BlockSpec(b2t.shape, lambda i: (0, 0)),
        ],
        # Lane-dense (5, TB) output block -> unmasked full-lane stores.
        out_specs=pl.BlockSpec((F_out, tb_eff), lambda i: (0, i)),
        compiler_params=pltpu.CompilerParams(
            dimension_semantics=("parallel",),
        ),
    )(x_t, w1t, b1t, w2t, b2t)

    # Transpose back to PyTorch's [batch, classes] and drop the padding.
    return out_t.T[:B]


def _init_linear_params(key, in_features, out_features):
    """Deterministic init mimicking PyTorch nn.Linear default:
    U(-1/sqrt(fan_in), 1/sqrt(fan_in)). Weight returned as [in, out]."""
    kw, kb = jax.random.split(key)
    bound = 1.0 / jnp.sqrt(jnp.float32(in_features))
    w = jax.random.uniform(
        kw, (in_features, out_features), jnp.float32, minval=-bound, maxval=bound
    )
    b = jax.random.uniform(
        kb, (out_features,), jnp.float32, minval=-bound, maxval=bound
    )
    return w, b


def _reference(x, w1, b1, w2, b2):
    h = jnp.maximum(x @ w1 + b1, 0.0)
    return jax.nn.softmax(h @ w2 + b2, axis=1)


if __name__ == "__main__":
    key = jax.random.PRNGKey(0)
    k_x, k_x2, k_l1, k_l2 = jax.random.split(key, 4)

    w1, b1 = _init_linear_params(k_l1, 10, 20)
    w2, b2 = _init_linear_params(k_l2, 20, 5)

    # Small primary case (matches the module spec shapes).
    batch = 8
    x = jax.random.normal(k_x, (batch, 10), jnp.float32)
    out = jax.block_until_ready(red_neuronal_ligera(x, w1, b1, w2, b2))
    ref = _reference(x, w1, b1, w2, b2)
    assert out.shape == (batch, 5)
    assert jnp.allclose(out, ref, atol=2e-3, rtol=2e-3)
    assert jnp.allclose(jnp.sum(out, axis=1), 1.0, atol=1e-3)

    # Multi-tile / padded case exercises the tiling and v7x two-step path.
    batch2 = 300
    x2 = jax.random.normal(k_x2, (batch2, 10), jnp.float32)
    out2 = jax.block_until_ready(red_neuronal_ligera(x2, w1, b1, w2, b2, tb=256))
    ref2 = _reference(x2, w1, b1, w2, b2)
    assert out2.shape == (batch2, 5)
    assert jnp.allclose(out2, ref2, atol=2e-3, rtol=2e-3)
    assert jnp.allclose(jnp.sum(out2, axis=1), 1.0, atol=1e-3)

    print("KERNEL_OK")
</pallas_src>

<mosaic_0001>
module attributes {stable_mosaic.version = 11 : i64} {
  func.func @_mlp_softmax_kernel(%arg0: i32, %arg1: memref<10x128xf32, #tpu.memory_space<vmem>>, %arg2: memref<20x10xf32, #tpu.memory_space<vmem>>, %arg3: memref<20x1xf32, #tpu.memory_space<vmem>>, %arg4: memref<5x20xf32, #tpu.memory_space<vmem>>, %arg5: memref<5x1xf32, #tpu.memory_space<vmem>>, %arg6: memref<5x128xf32, #tpu.memory_space<vmem>>) attributes {dimension_semantics = [#tpu.dimension_semantics<parallel>], iteration_bounds = array<i64: 1>, scalar_prefetch = 0 : i64, scratch_operands = 0 : i64, tpu.core_type = #tpu.core_type<tc>, window_params = [{transform_indices = @transform_0, window_bounds = array<i64: 10, 128>}, {pipeline_mode = #tpu.pipeline_mode<synchronous>, transform_indices = @transform_1, window_bounds = array<i64: 20, 10>}, {pipeline_mode = #tpu.pipeline_mode<synchronous>, transform_indices = @transform_2, window_bounds = array<i64: 20, 1>}, {pipeline_mode = #tpu.pipeline_mode<synchronous>, transform_indices = @transform_3, window_bounds = array<i64: 5, 20>}, {pipeline_mode = #tpu.pipeline_mode<synchronous>, transform_indices = @transform_4, window_bounds = array<i64: 5, 1>}, {transform_indices = @transform_5, window_bounds = array<i64: 5, 128>}]} {
    %c0 = arith.constant 0 : index
    %c0_0 = arith.constant 0 : index
    %0 = vector.load %arg2[%c0, %c0_0] : memref<20x10xf32, #tpu.memory_space<vmem>>, vector<20x10xf32>
    %c0_1 = arith.constant 0 : index
    %c0_2 = arith.constant 0 : index
    %1 = vector.load %arg1[%c0_1, %c0_2] : memref<10x128xf32, #tpu.memory_space<vmem>>, vector<10x128xf32>
    %cst = arith.constant dense<0.000000e+00> : vector<20x128xf32>
    %2 = tpu.matmul %0, %1, %cst {dimension_numbers = #tpu.dot_dimension_numbers<[1], [0], [0], [1], [0, 0, 1, 1], [], []>} : vector<20x10xf32>, vector<10x128xf32>, vector<20x128xf32> -> vector<20x128xf32>
    %c0_3 = arith.constant 0 : index
    %c0_4 = arith.constant 0 : index
    %3 = vector.load %arg3[%c0_3, %c0_4] : memref<20x1xf32, #tpu.memory_space<vmem>>, vector<20x1xf32>
    %4 = vector.broadcast %3 : vector<20x1xf32> to vector<20x128xf32>
    %5 = arith.addf %2, %4 : vector<20x128xf32>
    %cst_5 = arith.constant 0.000000e+00 : f32
    %6 = vector.broadcast %cst_5 : f32 to vector<20x128xf32>
    %7 = arith.maximumf %5, %6 : vector<20x128xf32>
    %c0_6 = arith.constant 0 : index
    %c0_7 = arith.constant 0 : index
    %8 = vector.load %arg4[%c0_6, %c0_7] : memref<5x20xf32, #tpu.memory_space<vmem>>, vector<5x20xf32>
    %cst_8 = arith.constant dense<0.000000e+00> : vector<5x128xf32>
    %9 = tpu.matmul %8, %7, %cst_8 {dimension_numbers = #tpu.dot_dimension_numbers<[1], [0], [0], [1], [0, 0, 1, 1], [], []>} : vector<5x20xf32>, vector<20x128xf32>, vector<5x128xf32> -> vector<5x128xf32>
    %c0_9 = arith.constant 0 : index
    %c0_10 = arith.constant 0 : index
    %10 = vector.load %arg5[%c0_9, %c0_10] : memref<5x1xf32, #tpu.memory_space<vmem>>, vector<5x1xf32>
    %11 = vector.broadcast %10 : vector<5x1xf32> to vector<5x128xf32>
    %12 = arith.addf %9, %11 : vector<5x128xf32>
    %cst_11 = arith.constant dense<0xFF800000> : vector<128xf32>
    %13 = vector.multi_reduction <maximumf>, %12, %cst_11 [0] : vector<5x128xf32> to vector<128xf32>
    %14 = vector.shape_cast %13 : vector<128xf32> to vector<1x128xf32>
    %15 = vector.broadcast %14 : vector<1x128xf32> to vector<5x128xf32>
    %16 = arith.subf %12, %15 : vector<5x128xf32>
    %17 = math.exp %16 : vector<5x128xf32>
    %cst_12 = arith.constant dense<0.000000e+00> : vector<128xf32>
    %18 = vector.multi_reduction <add>, %17, %cst_12 [0] : vector<5x128xf32> to vector<128xf32>
    %19 = vector.shape_cast %18 : vector<128xf32> to vector<1x128xf32>
    %20 = vector.broadcast %19 : vector<1x128xf32> to vector<5x128xf32>
    %21 = arith.divf %17, %20 : vector<5x128xf32>
    %c0_13 = arith.constant 0 : index
    %c0_14 = arith.constant 0 : index
    %22 = vector.load %arg6[%c0_13, %c0_14] : memref<5x128xf32, #tpu.memory_space<vmem>>, vector<5x128xf32>
    tpu.vector_store %arg6[%c0_13, %c0_14], %21 {strides = array<i32>} : memref<5x128xf32, #tpu.memory_space<vmem>>, vector<5x128xf32>,
    return
  }
  func.func @transform_0(%arg0: i32) -> (i32, i32) {
    %c0_i32 = arith.constant 0 : i32
    %c0_i32_0 = arith.constant 0 : i32
    return %c0_i32, %arg0 : i32, i32
  }
  func.func @transform_1(%arg0: i32) -> (i32, i32) {
    %c0_i32 = arith.constant 0 : i32
    %c0_i32_0 = arith.constant 0 : i32
    %c0_i32_1 = arith.constant 0 : i32
    return %c0_i32, %c0_i32_0 : i32, i32
  }
  func.func @transform_2(%arg0: i32) -> (i32, i32) {
    %c0_i32 = arith.constant 0 : i32
    %c0_i32_0 = arith.constant 0 : i32
    %c0_i32_1 = arith.constant 0 : i32
    return %c0_i32, %c0_i32_0 : i32, i32
  }
  func.func @transform_3(%arg0: i32) -> (i32, i32) {
    %c0_i32 = arith.constant 0 : i32
    %c0_i32_0 = arith.constant 0 : i32
    %c0_i32_1 = arith.constant 0 : i32
    return %c0_i32, %c0_i32_0 : i32, i32
  }
  func.func @transform_4(%arg0: i32) -> (i32, i32) {
    %c0_i32 = arith.constant 0 : i32
    %c0_i32_0 = arith.constant 0 : i32
    %c0_i32_1 = arith.constant 0 : i32
    return %c0_i32, %c0_i32_0 : i32, i32
  }
  func.func @transform_5(%arg0: i32) -> (i32, i32) {
    %c0_i32 = arith.constant 0 : i32
    %c0_i32_0 = arith.constant 0 : i32
    return %c0_i32, %arg0 : i32, i32
  }
}

</mosaic_0001>

<bundles_post_ra>
// kernel: tpu_custom_call.1
= control target key start
LH: loop header
LB: loop body
LE: loop exit
PB: predicated region body
PF: predicated region fallthrough
CT: control target
= control target key end

     0   :  { %vm54_vm0 = vcmask 1041408   ;;  %v341_v2 = vmov 0.0|0.0   ;;  %vm342_vm1 = vmmov 1   ;;  %vm343_vm3 = vmmov 0   ;;  %s426_s0 = inlined_call_operand.vmem [shape: f32[10,128], index: 0, kind: input, shape index: {}]   ;;  %s427_s1 = inlined_call_operand.vmem [shape: f32[20,10], index: 1, kind: input, shape index: {}]   ;;  %s428_s2 = inlined_call_operand.vmem [shape: f32[20,1], index: 2, kind: input, shape index: {}]   ;;  %s429_s3 = inlined_call_operand.vmem [shape: f32[5,20], index: 3, kind: input, shape index: {}]   ;;  %s430_s4 = inlined_call_operand.vmem [shape: f32[5,1], index: 4, kind: input, shape index: {}]   ;;  %s431_s5 = inlined_call_operand.hbm [shape: f32[5,128], index: 5, kind: output, shape index: {}]  }
   0x1   :  { %v24_v0 = vld [vmem:[%s426_s0] sm:$0xff]  ;;  %v25_v1 = vld [vmem:[%s426_s0 + $0x8] sm:$0x3]  ;;  %298 = vmatprep.subr.bf16.mxu0 %v341_v2  ;;  %vm300_vm2 = vmpackc.low %vm54_vm0, %vm342_vm1  ;;  %302 = vmatprep.subr.bf16.mxu1 %v341_v2  ;;  %v344_v4 = vmov 0.0   ;;  %vm44_vm4 = vcmask 80896   ;;  %v345_v7 = vmov 0  }
   0x2   :  { %v299_v3 = vpack.c.bf16 %v25_v1, %v24_v0  ;;  %280 = vmatprep.mubr.msk.f32.mxu0 %vm343_vm3, %v344_v4  ;;  %v26_v5 = vld [vmem:[%s428_s2] sm:$0xff]  ;;  %295 = vmatprep.mubr.msk.f32.mxu1 %vm343_vm3, %v344_v4  ;;  %v28_v8 = vld [vmem:[%s428_s2 + $0x10] sm:$0xf] }
   0x3   :  { %v21_v6 = vld [vmem:[%s427_s1] sm:$0xff]  ;;  %311 = vset.pattern.permute.xlu0 %v345_v7 }
   0x4   :  { %301 = vmatpush3.bf16.msk.msra.mxu0 %vm300_vm2, %v299_v3 }
   0x5   :  { %10 = vsyncpa [#allocation3], 0  ;;  %31 = vperm.xlu0 %311, %v26_v5   ;;  %312 = vset.pattern.permute.xlu1 %v345_v7  ;;  %v27_v9 = vld [vmem:[%s428_s2 + $0x8] sm:$0xff]  ;;  %v142_v10 = vld [vmem:[%s430_s4] sm:$0x1f]  ;;  %vm152_vm5 = vcmask 1043456  }
   0x6   :  { %41 = vperm.xlu1 %312, %v28_v8   ;;  %v22_v11 = vld [vmem:[%s427_s1 + $0x8] sm:$0xff]  ;;  %v23_v12 = vld [vmem:[%s427_s1 + $0x10] sm:$0xf]  ;;  %v141_v29 = vld [vmem:[%s429_s3] sm:$0x1f]  ;;  %vm148_vm6 = vcmask 162816  }
   0x7   :  { %281 = vmatmul.mubr.msk.f32.vlgmr.msra.gmra.mrb[0].mxu0 %vm44_vm4, %v21_v6  ;;  %vm226_vm7 = vcmask 1044480   ;;  %s346_s3 = smov [#allocation2]  }
   0x8   :  { %283 = vmatprep.mubr.msk.f32.mxu0 %vm343_vm3, %v344_v4  ;;  %s253_s9 = sshll.u32 %s346_s3, 4  ;;  %s254_s9 = int_to_ptr.vmem [resolvable:$true] %s253_s9 }
   0x9   :  { %36 = vperm.xlu0 %311, %v27_v9   ;;  %s317_s10 = scalar_lea.vmem %s254_s9, 128  ;;  %p322_p1 = scmp.lt.s32.totalorder %s254_s9, %s254_s9 }
   0xa   :  { %145 = vperm.xlu1 %312, %v142_v10   ;;  %p318_p0 = scmp.ne.s32.totalorder %s254_s9, %s317_s10  ;;  %p323_p2 = scmp.lt.s32.totalorder %s317_s10, %s317_s10 }
   0xb   :  { %284 = vmatmul.mubr.msk.f32.gmra.mrb[2].mxu0 %vm44_vm4, %v22_v11 }
   0xc   :  { %286 = vmatprep.mubr.msk.f32.mxu0 %vm343_vm3, %v344_v4  ;;  %p324_p3 = por %p323_p2, %p322_p1 }
   0xe   :  { %p325_p4 = pnand %p324_p3, %p318_p0 }
   0xf   :  { %287 = vmatmul.mubr.msk.f32.gmra.mrb[4].mxu0 %vm44_vm4, %v23_v12 }
  0x84   :  { %v32_v13 = vpop.permute.xlu0 %31 }
  0x85   :  { %v42_v23 = vpop.permute.xlu1 %41 }
  0x88   :  { %v37_v17 = vpop.permute.xlu0 %36 }
  0x89   :  { %v146_v30 = vpop.permute.xlu1 %145 }
  0xda   :  { %v124_v14 = vpop.f32.mrb[0].mxu0 }
  0xdb   :  { %v282_v15 = vpop.f32.mrb[1].mxu0  ;;  %v125_v16 = vadd.f32 %v124_v14, %v32_v13 }
  0xdd   :  { %v138_v21 = vmax.f32 %v125_v16, 0.0 }
  0xde   :  { %v129_v18 = vpop.f32.mrb[2].mxu0 }
  0xdf   :  { %v130_v19 = vadd.f32 %v129_v18, %v37_v17  ;;  %v285_v20 = vpop.f32.mrb[3].mxu0 }
  0xe1   :  { %v139_v22 = vmax.f32 %v130_v19, 0.0 }
  0xe2   :  { %v134_v24 = vpop.f32.mrb[4].mxu0 }
  0xe3   :  { %v135_v25 = vadd.f32 %v134_v24, %v42_v23  ;;  %v288_v26 = vpop.f32.mrb[5].mxu0  ;;  %v303_v27 = vpack.c.bf16 %v139_v22, %v138_v21 }
  0xe5   :  { %v140_v28 = vmax.f32 %v135_v25, 0.0  ;;  %304 = vmatpush3.bf16.msra.mxu1 %v303_v27 }
  0xe6   :  { %293 = vmatprep.subr.mxu1 %v344_v4 }
  0xe9   :  { %294 = vmatpush3.msk.msra.mxu1 %vm152_vm5, %v140_v28 }
  0xea   :  { %296 = vmatmul.mubr.msk.f32.vlgmr.msra.gmra.mrb[0].mxu1 %vm148_vm6, %v141_v29 }
 0x1bd   :  { %v222_v31 = vpop.f32.mrb[0].mxu1 }
 0x1be   :  { %v223_v32 = vadd.f32 %v222_v31, %v146_v30  ;;  %v297_v33 = vpop.f32.mrb[1].mxu1 }
 0x1c0   :  { %v227_v34 = vsel %vm226_vm7, %v223_v32, -inf }
 0x1c1   :  { %v228_v35 = vrot.slane %v227_v34, 4 }
 0x1c3   :  { %v229_v36 = vmax.f32 %v227_v34, %v228_v35 }
 0x1c5   :  { %v230_v37 = vrot.slane %v229_v36, 2 }
 0x1c7   :  { %v231_v38 = vmax.f32 %v229_v36, %v230_v37 }
 0x1c9   :  { %v232_v39 = vrot.slane %v231_v38, 1 }
 0x1cb   :  { %v233_v40 = vmax.f32 %v231_v38, %v232_v39 }
 0x1cd   :  { %v234_v41 = vsub.f32 %v223_v32, %v233_v40 }
 0x1cf   :  { %v235_v42 = vmul.f32 1.442695, %v234_v41 }
 0x1d1   :  { %313 = vpow2.f32 %v235_v42 }
 0x1db   :  { %v314_v43 = vpop.eup %313 }
 0x1dc   :  { %v237_v44 = vsel %vm226_vm7, %v314_v43, 0.0 }
 0x1dd   :  { %v238_v45 = vrot.slane %v237_v44, 4 }
 0x1df   :  { %v239_v46 = vadd.f32 %v238_v45, %v237_v44 }
 0x1e1   :  { %v240_v47 = vrot.slane %v239_v46, 2 }
 0x1e3   :  { %v241_v48 = vadd.f32 %v240_v47, %v239_v46 }
 0x1e5   :  { %v242_v49 = vrot.slane %v241_v48, 1 }
 0x1e7   :  { %v243_v50 = vadd.f32 %v242_v49, %v241_v48 }
 0x1e9   :  { %315 = vrcp.f32 %v243_v50 }
 0x1f3   :  { %v316_v51 = vpop.eup %315 }
 0x1f4   :  { %v245_v52 = vmul.f32 %v316_v51, %v314_v43 }
 0x1f6   :  { %246 = vst [vmem:[#allocation2] sm:$0x1f] %v245_v52 }
 0x1f7   :  { %328 = shalt.err (!%p325_p4)
}
 0x1f8   :  { %s329_s13 = scalar_lea.hbm %s431_s5, 128 }
 0x1f9   :  { %p330_p5 = scmp.ne.s32.totalorder %s431_s5, %s329_s13  ;;  %p333_p6 = scmp.lt.u32.totalorder %s329_s13, %s431_s5 }
 0x1fb   :  { %p335_p7 = pnand %p333_p6, %p330_p5 }
 0x1fd   :  { %338 = shalt.err (!%p335_p7)
}
 0x1fe   :  { %256 = dma.vmem_to_hbm [thread:$0]  %s254_s9, 128, %s431_s5, [#allocation3]  }
 0x1ff   :  { %339 = dma.done.wait [#allocation3], 128  }
 0x200   :  { %340 = vsyncadd [#allocation3], 4294967168 }
 0x201   :  { %260 = vsyncpa [#allocation3], 1 }

</bundles_post_ra>
